<compile_context>
chip_gen: v6e
topology: v6e:2x2x1
jax: 0.10.0
libtpu: 0.0.40
codegen_flags: <defaults>
</compile_context>

<pallas_src>
import functools

import numpy as np
import jax
import jax.numpy as jnp
from jax.experimental import pallas as pl
from jax.experimental.pallas import tpu as pltpu

_EPS = 1e-7
_LANES = 128
_DEFAULT_BLOCK_ROWS = 1024                       # (1024,128) f32 tile = 512 KiB
_INV_LN10 = float(1.0 / np.log(10.0))
_LOGIT_CLAMP = float(np.log((1.0 - _EPS) / _EPS))  # logit(1-eps) ~ 16.118
_LOG_EPS = float(np.log(_EPS))                     # log(eps)     ~ -16.118
_LOG_1MEPS = float(np.log(1.0 - _EPS))             # log(1-eps)   ~ -1e-7


def _branch_num_sums(branch: str) -> int:
    # bce_dice needs sum(bce), sum(p*y), sum(p+y); other branches need 1 sum.
    return 3 if branch == "bce_dice" else 1


def _make_kernel(branch: str, n_valid: int, block_rows: int, num_blocks: int):
    """Pallas kernel specialized for one loss branch and one static geometry."""
    block_elems = block_rows * _LANES
    rem = n_valid - (num_blocks - 1) * block_elems   # valid elements in last block
    needs_mask = (rem != block_elems)                # static Python bool

    def compute_terms(x, y):
        if branch == "bce_dice":
            # softplus pieces shared between log(p) and log(1-p):
            #   log(sigmoid(x))   = -(max(-x,0) + log(1+exp(-|x|)))
            #   log(1-sigmoid(x)) = -(max( x,0) + log(1+exp(-|x|)))
            t = jnp.log(1.0 + jnp.exp(-jnp.abs(x)))
            log_p = -(jnp.maximum(-x, 0.0) + t)
            log_q = -(jnp.maximum(x, 0.0) + t)
            # F.binary_cross_entropy clamps each log term at -100.
            bce = -(y * jnp.maximum(log_p, -100.0)
                    + (1.0 - y) * jnp.maximum(log_q, -100.0))
            p = jnp.exp(log_p)                       # == sigmoid(x), reuses softplus
            return [bce, p * y, p + y]
        if branch == "logit":
            # y*logit(clip(sigmoid(x))) + (1-y)*logit(1-clip(...)) == (2y-1)*clip(x,+-L)
            xc = jnp.clip(x, -_LOGIT_CLAMP, _LOGIT_CLAMP)
            return [(2.0 * y - 1.0) * xc]
        if branch in ("log", "log10"):
            # log(clip(sigmoid(x), eps, 1-eps)) = clip(-softplus(-x), log eps, log(1-eps))
            t = jnp.log(1.0 + jnp.exp(-jnp.abs(x)))
            la = jnp.clip(-(jnp.maximum(-x, 0.0) + t), _LOG_EPS, _LOG_1MEPS)
            lb = jnp.clip(-(jnp.maximum(x, 0.0) + t), _LOG_EPS, _LOG_1MEPS)
            term = y * la + (1.0 - y) * lb
            if branch == "log10":
                term = term * jnp.float32(_INV_LN10)
            return [term]
        # fisher / arcsin keep the sigmoid + clip form.
        pc = jnp.clip(jax.nn.sigmoid(x), _EPS, 1.0 - _EPS)
        if branch == "fisher":
            f = lambda q: 0.5 * jnp.log((1.0 + q) / (1.0 - q))
        elif branch == "arcsin":
            f = lambda q: jnp.arcsin(jnp.sqrt(q))
        else:
            raise ValueError(f"unknown branch {branch}")
        return [y * f(pc) + (1.0 - y) * f(1.0 - pc)]

    def kernel(logits_ref, ytrue_ref, out_ref, *acc_refs):
        i = pl.program_id(0)
        last = num_blocks - 1

        @pl.when(i == 0)
        def _init():
            for a in acc_refs:
                a[...] = jnp.zeros_like(a)

        x = logits_ref[...].astype(jnp.float32)
        y = ytrue_ref[...].astype(jnp.float32)
        terms = compute_terms(x, y)

        def accumulate(ts):
            for a, t in zip(acc_refs, ts):
                a[...] += t

        def finalize():
            for k, a in enumerate(acc_refs):
                out_ref[k] = jnp.sum(a[...])

        if needs_mask:
            @pl.when(i < last)
            def _body():
                accumulate(terms)

            @pl.when(i == last)
            def _tail():
                ridx = jax.lax.broadcasted_iota(jnp.int32, (block_rows, _LANES), 0)
                lidx = jax.lax.broadcasted_iota(jnp.int32, (block_rows, _LANES), 1)
                valid = (ridx * _LANES + lidx) < rem
                accumulate([jnp.where(valid, t, 0.0) for t in terms])
                finalize()
        else:
            accumulate(terms)

            @pl.when(i == last)
            def _tail():
                finalize()

    return kernel


@functools.lru_cache(maxsize=None)
def _build_reduce(branch: str, n_valid: int, rows: int, block_rows: int):
    num_blocks = pl.cdiv(rows, block_rows)
    n_sums = _branch_num_sums(branch)
    kernel = _make_kernel(branch, n_valid, block_rows, num_blocks)
    tile = pl.BlockSpec((block_rows, _LANES), lambda i: (i, 0))
    return pl.pallas_call(
        kernel,
        out_shape=jax.ShapeDtypeStruct((n_sums,), jnp.float32),
        grid=(num_blocks,),
        in_specs=[tile, tile],
        out_specs=pl.BlockSpec(memory_space=pltpu.MemorySpace.SMEM),
        scratch_shapes=[pltpu.VMEM((block_rows, _LANES), jnp.float32)
                        for _ in range(n_sums)],
        compiler_params=pltpu.CompilerParams(
            dimension_semantics=("arbitrary",)),
    )


def _pallas_reduce(logits, y_true, branch: str, max_block_rows: int):
    """Flatten (native dtype) -> lane-dense (rows,128) view -> fused reduction."""
    assert max_block_rows % 8 == 0, "max_block_rows must be a multiple of 8"
    n = int(np.prod(logits.shape))
    flat_l = jnp.ravel(logits)          # native dtype on the wire; cast in-kernel
    flat_y = jnp.ravel(y_true)

    pad = (-n) % _LANES                 # only pad when the lane dim requires it
    if pad:
        flat_l = jnp.pad(flat_l, (0, pad))
        flat_y = jnp.pad(flat_y, (0, pad))
    rows = (n + pad) // _LANES

    # Small inputs: one whole-array block (always a legal block shape).
    # Large inputs: big (block_rows,128) tiles, cdiv grid, in-kernel tail mask.
    block_rows = rows if rows <= max_block_rows else int(max_block_rows)

    fn = _build_reduce(branch, n, rows, block_rows)
    sums = fn(flat_l.reshape(rows, _LANES), flat_y.reshape(rows, _LANES))
    return sums, n


@functools.partial(jax.jit, static_argnames=("branch", "max_block_rows"))
def _adaptive_loss(logits, y_true, *, branch: str,
                   max_block_rows: int = _DEFAULT_BLOCK_ROWS):
    sums, n = _pallas_reduce(logits, y_true, branch, max_block_rows)
    n_f = jnp.float32(n)
    if branch == "bce_dice":
        bce = sums[0] / n_f
        smooth = jnp.float32(1e-7)
        dice = (2.0 * sums[1] + smooth) / (sums[2] + smooth)
        return bce + (1.0 - dice)
    # loss = -mean(y*f(p) + (1-y)*f(1-p))
    return -(sums[0] / n_f)


class AdaptiveDistributionLossPallas:
    """JAX/Pallas port of AdaptiveDistributionLoss (forward pass)."""

    def __init__(self, max_block_rows: int = _DEFAULT_BLOCK_ROWS):
        self.total_area = []
        self.background_area = []
        self.max_block_rows = max_block_rows

    def calculate_areas(self, batch_masks):
        # TODO(synk): cv2.findContours/cv2.contourArea have no JAX/Pallas
        # equivalent; foreground area is approximated by the binarized pixel
        # count of each mask (host-side numpy, same role as the original).
        self.total_area = []
        self.background_area = []
        for mask in batch_masks:
            mask_np = (np.asarray(mask).squeeze() * 255).astype(np.uint8)
            area_fg = float(np.count_nonzero(mask_np))
            self.total_area.append(area_fg)
            h, w = mask_np.shape
            self.background_area.append(float(h * w) - area_fg)

    @staticmethod
    def _skew(x):
        # scipy.stats.skew with default bias=True
        x = np.asarray(x, np.float64)
        m = x.mean()
        m2 = np.mean((x - m) ** 2)
        m3 = np.mean((x - m) ** 3)
        return float(m3 / m2 ** 1.5) if m2 > 0 else 0.0

    @staticmethod
    def _kurtosis(x):
        # scipy.stats.kurtosis with fisher=True, bias=True
        x = np.asarray(x, np.float64)
        m = x.mean()
        m2 = np.mean((x - m) ** 2)
        m4 = np.mean((x - m) ** 4)
        return float(m4 / m2 ** 2 - 3.0) if m2 > 0 else -3.0

    def _select_branch(self):
        skewness = self._skew(self.total_area)
        kurt = self._kurtosis(self.total_area)
        if skewness < 0:
            if skewness <= -1:
                return "fisher"
            elif -1 < skewness <= -0.5:
                return "logit"
            else:
                return "arcsin"
        elif skewness >= 1:
            return "log10"
        elif 0.5 <= skewness < 1:
            return "log"
        elif 0 < skewness <= 0.5 and kurt < 0:
            return "log10"
        else:
            return "bce_dice"

    def forward(self, logits, y_true):
        branch = self._select_branch()
        return _adaptive_loss(logits, y_true, branch=branch,
                              max_block_rows=int(self.max_block_rows))

    __call__ = forward


def _reference_loss(logits, y_true, branch):
    """Pure-JAX reference mirroring the PyTorch forward (for validation)."""
    x = logits.astype(jnp.float32)
    y = y_true.astype(jnp.float32)
    p = jax.nn.sigmoid(x)
    if branch == "bce_dice":
        lp = jnp.maximum(jnp.log(p), -100.0)
        lq = jnp.maximum(jnp.log(1.0 - p), -100.0)
        bce = jnp.mean(-(y * lp + (1.0 - y) * lq))
        smooth = 1e-7
        inter = jnp.sum(p * y)
        dice = (2.0 * inter + smooth) / (jnp.sum(p) + jnp.sum(y) + smooth)
        return bce + (1.0 - dice)
    pc = jnp.clip(p, _EPS, 1.0 - _EPS)
    if branch == "fisher":
        f = lambda q: 0.5 * jnp.log((1.0 + q) / (1.0 - q))
    elif branch == "logit":
        f = lambda q: jnp.log(q / (1.0 - q))
    elif branch == "arcsin":
        f = lambda q: jnp.arcsin(jnp.sqrt(q))
    elif branch == "log10":
        f = lambda q: jnp.log(q) * _INV_LN10
    else:
        f = lambda q: jnp.log(q)
    return -jnp.mean(y * f(pc) + (1.0 - y) * f(1.0 - pc))


if __name__ == "__main__":
    key = jax.random.PRNGKey(0)
    k1, k2, k3, k4 = jax.random.split(key, 4)

    loss_mod = AdaptiveDistributionLossPallas()

    # Case 1: bce_dice branch (2-sample area stats -> skew == 0), NCHW (2,1,16,16).
    B, C, H, W = 2, 1, 16, 16
    logits = jax.random.normal(k1, (B, C, H, W), dtype=jnp.float32)
    y_true = (jax.random.uniform(k2, (B, C, H, W)) > 0.5).astype(jnp.float32)
    loss_mod.calculate_areas(np.asarray(y_true))
    branch1 = loss_mod._select_branch()
    v1 = jax.block_until_ready(loss_mod(logits, y_true))
    r1 = float(_reference_loss(logits, y_true, branch1))
    assert np.isfinite(float(v1))
    assert np.allclose(float(v1), r1, rtol=1e-3, atol=1e-3), (float(v1), r1)

    # Case 2: log10 branch (skew >= 1) at a size that forces multi-block
    # accumulation (override max_block_rows so the grid has several steps).
    B2, C2, H2, W2 = 2, 4, 32, 32            # n = 8192 -> 64 rows of 128 lanes
    logits2 = jax.random.normal(k3, (B2, C2, H2, W2), dtype=jnp.float32)
    y2 = (jax.random.uniform(k4, (B2, C2, H2, W2)) > 0.5).astype(jnp.float32)
    loss_mod.total_area = [1.0, 1.0, 1.0, 100.0]
    loss_mod.background_area = [255.0, 255.0, 255.0, 156.0]
    loss_mod.max_block_rows = 16             # 4 grid steps of (16, 128) tiles
    v2 = jax.block_until_ready(loss_mod(logits2, y2))
    r2 = float(_reference_loss(logits2, y2, "log10"))
    assert np.isfinite(float(v2))
    assert np.allclose(float(v2), r2, rtol=1e-3, atol=1e-3), (float(v2), r2)
    loss_mod.max_block_rows = _DEFAULT_BLOCK_ROWS

    # Case 3: logit branch (skew in (-1, -0.5]) with a ragged element count
    # (n % 128 != 0) exercising the in-kernel iota tail mask.
    B3, C3, H3, W3 = 2, 1, 20, 20            # n = 800 -> 7 rows (last 96 lanes padded)
    logits3 = jax.random.normal(k1, (B3, C3, H3, W3), dtype=jnp.float32)
    y3 = (jax.random.uniform(k2, (B3, C3, H3, W3)) > 0.5).astype(jnp.float32)
    loss_mod.total_area = [10.0, 9.0, 8.0, 2.0]       # skew ~ -0.98 -> logit branch
    loss_mod.background_area = [390.0, 391.0, 392.0, 398.0]
    v3 = jax.block_until_ready(loss_mod(logits3, y3))
    r3 = float(_reference_loss(logits3, y3, "logit"))
    assert np.isfinite(float(v3))
    assert np.allclose(float(v3), r3, rtol=1e-3, atol=1e-3), (float(v3), r3)

    print("KERNEL_OK")
</pallas_src>

<mosaic_0001>
module attributes {stable_mosaic.version = 11 : i64} {
  func.func @kernel(%arg0: i32, %arg1: memref<4x128xf32, #tpu.memory_space<vmem>>, %arg2: memref<4x128xf32, #tpu.memory_space<vmem>>, %arg3: memref<3xf32, #tpu.memory_space<smem>>, %arg4: memref<4x128xf32, #tpu.memory_space<vmem>>, %arg5: memref<4x128xf32, #tpu.memory_space<vmem>>, %arg6: memref<4x128xf32, #tpu.memory_space<vmem>>) attributes {dimension_semantics = [#tpu.dimension_semantics<arbitrary>], iteration_bounds = array<i64: 1>, scalar_prefetch = 0 : i64, scratch_operands = 3 : i64, tpu.core_type = #tpu.core_type<tc>, window_params = [{transform_indices = @transform_0, window_bounds = array<i64: 4, 128>}, {transform_indices = @transform_1, window_bounds = array<i64: 4, 128>}, {transform_indices = @transform_2, window_bounds = array<i64: 3>}]} {
    %c0_i32 = arith.constant 0 : i32
    %0 = arith.cmpi eq, %arg0, %c0_i32 : i32
    %1 = arith.extui %0 : i1 to i32
    %c0_i32_0 = arith.constant 0 : i32
    %2 = arith.cmpi ne, %1, %c0_i32_0 : i32
    scf.if %2 {
      %cst_28 = arith.constant 0.000000e+00 : f32
      %50 = vector.broadcast %cst_28 : f32 to vector<4x128xf32>
      %c0_29 = arith.constant 0 : index
      %c0_30 = arith.constant 0 : index
      %51 = vector.load %arg4[%c0_29, %c0_30] : memref<4x128xf32, #tpu.memory_space<vmem>>, vector<4x128xf32>
      tpu.vector_store %arg4[%c0_29, %c0_30], %50 {strides = array<i32>} : memref<4x128xf32, #tpu.memory_space<vmem>>, vector<4x128xf32>,
      %cst_31 = arith.constant 0.000000e+00 : f32
      %52 = vector.broadcast %cst_31 : f32 to vector<4x128xf32>
      %c0_32 = arith.constant 0 : index
      %c0_33 = arith.constant 0 : index
      %53 = vector.load %arg5[%c0_32, %c0_33] : memref<4x128xf32, #tpu.memory_space<vmem>>, vector<4x128xf32>
      tpu.vector_store %arg5[%c0_32, %c0_33], %52 {strides = array<i32>} : memref<4x128xf32, #tpu.memory_space<vmem>>, vector<4x128xf32>,
      %cst_34 = arith.constant 0.000000e+00 : f32
      %54 = vector.broadcast %cst_34 : f32 to vector<4x128xf32>
      %c0_35 = arith.constant 0 : index
      %c0_36 = arith.constant 0 : index
      %55 = vector.load %arg6[%c0_35, %c0_36] : memref<4x128xf32, #tpu.memory_space<vmem>>, vector<4x128xf32>
      tpu.vector_store %arg6[%c0_35, %c0_36], %54 {strides = array<i32>} : memref<4x128xf32, #tpu.memory_space<vmem>>, vector<4x128xf32>,
    } else {
    }
    %c0 = arith.constant 0 : index
    %c0_1 = arith.constant 0 : index
    %3 = vector.load %arg1[%c0, %c0_1] : memref<4x128xf32, #tpu.memory_space<vmem>>, vector<4x128xf32>
    %c0_2 = arith.constant 0 : index
    %c0_3 = arith.constant 0 : index
    %4 = vector.load %arg2[%c0_2, %c0_3] : memref<4x128xf32, #tpu.memory_space<vmem>>, vector<4x128xf32>
    %5 = math.absf %3 : vector<4x128xf32>
    %cst = arith.constant 0.000000e+00 : f32
    %6 = vector.broadcast %cst : f32 to vector<4x128xf32>
    %7 = arith.subf %6, %5 : vector<4x128xf32>
    %8 = math.exp %7 : vector<4x128xf32>
    %cst_4 = arith.constant 1.000000e+00 : f32
    %9 = vector.broadcast %cst_4 : f32 to vector<4x128xf32>
    %10 = arith.addf %9, %8 : vector<4x128xf32>
    %11 = math.log %10 : vector<4x128xf32>
    %cst_5 = arith.constant 0.000000e+00 : f32
    %12 = vector.broadcast %cst_5 : f32 to vector<4x128xf32>
    %13 = arith.subf %12, %3 : vector<4x128xf32>
    %cst_6 = arith.constant 0.000000e+00 : f32
    %14 = vector.broadcast %cst_6 : f32 to vector<4x128xf32>
    %15 = arith.maximumf %13, %14 : vector<4x128xf32>
    %16 = arith.addf %15, %11 : vector<4x128xf32>
    %cst_7 = arith.constant 0.000000e+00 : f32
    %17 = vector.broadcast %cst_7 : f32 to vector<4x128xf32>
    %18 = arith.subf %17, %16 : vector<4x128xf32>
    %cst_8 = arith.constant 0.000000e+00 : f32
    %19 = vector.broadcast %cst_8 : f32 to vector<4x128xf32>
    %20 = arith.maximumf %3, %19 : vector<4x128xf32>
    %21 = arith.addf %20, %11 : vector<4x128xf32>
    %cst_9 = arith.constant 0.000000e+00 : f32
    %22 = vector.broadcast %cst_9 : f32 to vector<4x128xf32>
    %23 = arith.subf %22, %21 : vector<4x128xf32>
    %cst_10 = arith.constant -1.000000e+02 : f32
    %24 = vector.broadcast %cst_10 : f32 to vector<4x128xf32>
    %25 = arith.maximumf %18, %24 : vector<4x128xf32>
    %26 = arith.mulf %4, %25 : vector<4x128xf32>
    %cst_11 = arith.constant 1.000000e+00 : f32
    %27 = vector.broadcast %cst_11 : f32 to vector<4x128xf32>
    %28 = arith.subf %27, %4 : vector<4x128xf32>
    %cst_12 = arith.constant -1.000000e+02 : f32
    %29 = vector.broadcast %cst_12 : f32 to vector<4x128xf32>
    %30 = arith.maximumf %23, %29 : vector<4x128xf32>
    %31 = arith.mulf %28, %30 : vector<4x128xf32>
    %32 = arith.addf %26, %31 : vector<4x128xf32>
    %cst_13 = arith.constant 0.000000e+00 : f32
    %33 = vector.broadcast %cst_13 : f32 to vector<4x128xf32>
    %34 = arith.subf %33, %32 : vector<4x128xf32>
    %35 = math.exp %18 : vector<4x128xf32>
    %36 = arith.mulf %35, %4 : vector<4x128xf32>
    %37 = arith.addf %35, %4 : vector<4x128xf32>
    %c0_14 = arith.constant 0 : index
    %c0_15 = arith.constant 0 : index
    %38 = vector.load %arg4[%c0_14, %c0_15] : memref<4x128xf32, #tpu.memory_space<vmem>>, vector<4x128xf32>
    %39 = arith.addf %38, %34 : vector<4x128xf32>
    %c0_16 = arith.constant 0 : index
    %c0_17 = arith.constant 0 : index
    %40 = vector.load %arg4[%c0_16, %c0_17] : memref<4x128xf32, #tpu.memory_space<vmem>>, vector<4x128xf32>
    tpu.vector_store %arg4[%c0_16, %c0_17], %39 {strides = array<i32>} : memref<4x128xf32, #tpu.memory_space<vmem>>, vector<4x128xf32>,
    %c0_18 = arith.constant 0 : index
    %c0_19 = arith.constant 0 : index
    %41 = vector.load %arg5[%c0_18, %c0_19] : memref<4x128xf32, #tpu.memory_space<vmem>>, vector<4x128xf32>
    %42 = arith.addf %41, %36 : vector<4x128xf32>
    %c0_20 = arith.constant 0 : index
    %c0_21 = arith.constant 0 : index
    %43 = vector.load %arg5[%c0_20, %c0_21] : memref<4x128xf32, #tpu.memory_space<vmem>>, vector<4x128xf32>
    tpu.vector_store %arg5[%c0_20, %c0_21], %42 {strides = array<i32>} : memref<4x128xf32, #tpu.memory_space<vmem>>, vector<4x128xf32>,
    %c0_22 = arith.constant 0 : index
    %c0_23 = arith.constant 0 : index
    %44 = vector.load %arg6[%c0_22, %c0_23] : memref<4x128xf32, #tpu.memory_space<vmem>>, vector<4x128xf32>
    %45 = arith.addf %44, %37 : vector<4x128xf32>
    %c0_24 = arith.constant 0 : index
    %c0_25 = arith.constant 0 : index
    %46 = vector.load %arg6[%c0_24, %c0_25] : memref<4x128xf32, #tpu.memory_space<vmem>>, vector<4x128xf32>
    tpu.vector_store %arg6[%c0_24, %c0_25], %45 {strides = array<i32>} : memref<4x128xf32, #tpu.memory_space<vmem>>, vector<4x128xf32>,
    %c0_i32_26 = arith.constant 0 : i32
    %47 = arith.cmpi eq, %arg0, %c0_i32_26 : i32
    %48 = arith.extui %47 : i1 to i32
    %c0_i32_27 = arith.constant 0 : i32
    %49 = arith.cmpi ne, %48, %c0_i32_27 : i32
    scf.if %49 {
      %c0_28 = arith.constant 0 : index
      %c0_29 = arith.constant 0 : index
      %50 = vector.load %arg4[%c0_28, %c0_29] : memref<4x128xf32, #tpu.memory_space<vmem>>, vector<4x128xf32>
      %51 = vector.shape_cast %50 : vector<4x128xf32> to vector<1x4x128xf32>
      %cst_30 = arith.constant dense<0.000000e+00> : vector<1xf32>
      %52 = vector.multi_reduction <add>, %51, %cst_30 [1, 2] : vector<1x4x128xf32> to vector<1xf32>
      %53 = vector.shape_cast %52 : vector<1xf32> to vector<1x1x1xf32>
      %54 = vector.extract %53[0, 0, 0] : f32 from vector<1x1x1xf32>
      %c0_31 = arith.constant 0 : index
      %55 = memref.load %arg3[%c0_31] : memref<3xf32, #tpu.memory_space<smem>>
      memref.store %54, %arg3[%c0_31] : memref<3xf32, #tpu.memory_space<smem>>
      %c0_32 = arith.constant 0 : index
      %c0_33 = arith.constant 0 : index
      %56 = vector.load %arg5[%c0_32, %c0_33] : memref<4x128xf32, #tpu.memory_space<vmem>>, vector<4x128xf32>
      %57 = vector.shape_cast %56 : vector<4x128xf32> to vector<1x4x128xf32>
      %cst_34 = arith.constant dense<0.000000e+00> : vector<1xf32>
      %58 = vector.multi_reduction <add>, %57, %cst_34 [1, 2] : vector<1x4x128xf32> to vector<1xf32>
      %59 = vector.shape_cast %58 : vector<1xf32> to vector<1x1x1xf32>
      %60 = vector.extract %59[0, 0, 0] : f32 from vector<1x1x1xf32>
      %c1 = arith.constant 1 : index
      %61 = memref.load %arg3[%c1] : memref<3xf32, #tpu.memory_space<smem>>
      memref.store %60, %arg3[%c1] : memref<3xf32, #tpu.memory_space<smem>>
      %c0_35 = arith.constant 0 : index
      %c0_36 = arith.constant 0 : index
      %62 = vector.load %arg6[%c0_35, %c0_36] : memref<4x128xf32, #tpu.memory_space<vmem>>, vector<4x128xf32>
      %63 = vector.shape_cast %62 : vector<4x128xf32> to vector<1x4x128xf32>
      %cst_37 = arith.constant dense<0.000000e+00> : vector<1xf32>
      %64 = vector.multi_reduction <add>, %63, %cst_37 [1, 2] : vector<1x4x128xf32> to vector<1xf32>
      %65 = vector.shape_cast %64 : vector<1xf32> to vector<1x1x1xf32>
      %66 = vector.extract %65[0, 0, 0] : f32 from vector<1x1x1xf32>
      %c2 = arith.constant 2 : index
      %67 = memref.load %arg3[%c2] : memref<3xf32, #tpu.memory_space<smem>>
      memref.store %66, %arg3[%c2] : memref<3xf32, #tpu.memory_space<smem>>
    } else {
    }
    return
  }
  func.func @transform_0(%arg0: i32) -> (i32, i32) {
    %c0_i32 = arith.constant 0 : i32
    %c0_i32_0 = arith.constant 0 : i32
    return %arg0, %c0_i32 : i32, i32
  }
  func.func @transform_1(%arg0: i32) -> (i32, i32) {
    %c0_i32 = arith.constant 0 : i32
    %c0_i32_0 = arith.constant 0 : i32
    return %arg0, %c0_i32 : i32, i32
  }
  func.func @transform_2(%arg0: i32) -> i32 {
    %c0_i32 = arith.constant 0 : i32
    %c0_i32_0 = arith.constant 0 : i32
    return %c0_i32 : i32
  }
}

</mosaic_0001>

<bundles_post_ra>
// kernel: _adaptive_loss.1
= control target key start
LH: loop header
LB: loop body
LE: loop exit
PB: predicated region body
PF: predicated region fallthrough
CT: control target
= control target key end

     0   :  { %v141_v1 = vmov 0.0   ;;  %s167_s0 = inlined_call_operand.vmem [shape: f32[4,128], index: 0, kind: input, shape index: {}]   ;;  %s168_s1 = inlined_call_operand.vmem [shape: f32[4,128], index: 1, kind: input, shape index: {}]   ;;  %s169_s2 = inlined_call_operand.vmem [shape: f32[3], index: 2, kind: output, shape index: {}]  }
   0x1   :  { %v19_v0 = vld [vmem:[%s167_s0] sm:$0xf]  ;;  %16 = vst [vmem:[#allocation2] sm:$0xf] %v141_v1  ;;  %17 = vst [vmem:[#allocation3] sm:$0xf] %v141_v1 }
   0x2   :  { %v21_v2 = vand.u32 2147483647, %v19_v0  ;;  %18 = vst [vmem:[#allocation4] sm:$0xf] %v141_v1 }
   0x3   :  { %7 = vsyncpa [#allocation6], 0  ;;  %v28_v7 = vsub.f32 0.0, %v19_v0  ;;  %v32_v9 = vmax.f32 %v19_v0, 0.0  ;;  %v20_v12 = vld [vmem:[%s168_s1] sm:$0xf] }
   0x4   :  { %v22_v3 = vsub.f32 0.0, %v21_v2  ;;  %v37_v17 = vsub.f32 1.0, %v20_v12  ;;  %vm59_vm0 = vcmask 1043456   ;;  %s104_s14 = sshll.u32 %s169_s2, 4  ;;  %s105_s14 = int_to_ptr.vmem [resolvable:$true] %s104_s14 }
   0x5   :  { %v29_v8 = vmax.f32 %v28_v7, 0.0  ;;  %s127_s17 = scalar_lea.vmem %s105_s14, 16  ;;  %p132_p1 = scmp.lt.s32.totalorder %s105_s14, %s105_s14 }
   0x6   :  { %v23_v4 = vmul.f32 1.442695, %v22_v3  ;;  %p128_p0 = scmp.ne.s32.totalorder %s105_s14, %s127_s17  ;;  %p133_p2 = scmp.lt.s32.totalorder %s127_s17, %s127_s17 }
   0x8   :  { %121 = vpow2.f32 %v23_v4  ;;  %v46_v24 = vld [vmem:[#allocation2] sm:$0xf]  ;;  %v49_v29 = vld [vmem:[#allocation3] sm:$0xf]  ;;  %p134_p3 = por %p133_p2, %p132_p1 }
   0x9   :  { %v52_v28 = vld [vmem:[#allocation4] sm:$0xf] }
   0xa   :  { %p135_p4 = pnand %p134_p3, %p128_p0 }
  0x15   :  { %v122_v5 = vpop.eup %121 }
  0x16   :  { %v25_v6 = vadd.f32 1.0, %v122_v5 }
  0x18   :  { %123 = vlog2.f32 %v25_v6 }
  0x25   :  { %v124_v10 = vpop.eup %123 }
  0x26   :  { %v27_v11 = vmul.f32 0.6931472, %v124_v10 }
  0x28   :  { %v30_v13 = vadd.f32 %v29_v8, %v27_v11  ;;  %v33_v14 = vadd.f32 %v32_v9, %v27_v11 }
  0x2a   :  { %v31_v15 = vsub.f32 0.0, %v30_v13  ;;  %v34_v16 = vsub.f32 0.0, %v33_v14 }
  0x2c   :  { %v35_v18 = vmax.f32 %v31_v15, -100.0  ;;  %v38_v19 = vmax.f32 %v34_v16, -100.0  ;;  %v42_v20 = vmul.f32 1.442695, %v31_v15 }
  0x2e   :  { %v36_v21 = vmul.f32 %v35_v18, %v20_v12  ;;  %v39_v22 = vmul.f32 %v38_v19, %v37_v17  ;;  %125 = vpow2.f32 %v42_v20 }
  0x30   :  { %v40_v23 = vadd.f32 %v39_v22, %v36_v21 }
  0x32   :  { %v41_v25 = vsub.f32 0.0, %v40_v23 }
  0x34   :  { %v47_v26 = vadd.f32 %v46_v24, %v41_v25 }
  0x36   :  { %48 = vst [vmem:[#allocation2] sm:$0xf] %v47_v26 }
  0x3b   :  { %v126_v27 = vpop.eup %125 }
  0x3c   :  { %v45_v30 = vadd.f32 %v126_v27, %v20_v12  ;;  %v44_v31 = vmul.f32 %v126_v27, %v20_v12 }
  0x3d   :  { %v58_v32 = vld [vmem:[#allocation2] sm:$0xf] }
  0x3e   :  { %v60_v33 = vsel %vm59_vm0, %v58_v32, 0.0  ;;  %v53_v34 = vadd.f32 %v52_v28, %v45_v30  ;;  %v50_v35 = vadd.f32 %v49_v29, %v44_v31 }
  0x3f   :  { %61 = vadd.xlane.f32.xlu0 %v60_v33 }
  0x40   :  { %54 = vst [vmem:[#allocation4] sm:$0xf] %v53_v34  ;;  %51 = vst [vmem:[#allocation3] sm:$0xf] %v50_v35 }
  0x47   :  { %v85_v36 = vld [vmem:[#allocation4] sm:$0xf]  ;;  %v72_v37 = vld [vmem:[#allocation3] sm:$0xf] }
  0x48   :  { %v86_v38 = vsel %vm59_vm0, %v85_v36, 0.0  ;;  %v73_v39 = vsel %vm59_vm0, %v72_v37, 0.0 }
  0x49   :  { %87 = vadd.xlane.f32.xlu1 %v86_v38  ;;  %74 = vadd.xlane.f32.xlu0 %v73_v39 }
  0xc8   :  { %v62_v40 = vpop.xlane.xlu0 %61 }
  0xc9   :  { %v63_v41 = vrot.slane %v62_v40, 4 }
  0xcb   :  { %v64_v42 = vadd.f32 %v63_v41, %v62_v40 }
  0xcd   :  { %v65_v43 = vrot.slane %v64_v42, 2 }
  0xcf   :  { %v66_v44 = vadd.f32 %v65_v43, %v64_v42 }
  0xd1   :  { %v67_v45 = vrot.slane %v66_v44, 1 }
  0xd2   :  { %v88_v46 = vpop.xlane.xlu1 %87  ;;  %v75_v47 = vpop.xlane.xlu0 %74 }
  0xd3   :  { %v89_v48 = vrot.slane %v88_v46, 4  ;;  %v76_v49 = vrot.slane %v75_v47, 4  ;;  %v68_v50 = vadd.f32 %v67_v45, %v66_v44 }
  0xd5   :  { %v90_v51 = vadd.f32 %v89_v48, %v88_v46  ;;  %v77_v52 = vadd.f32 %v76_v49, %v75_v47  ;;  %113 = vpush %v68_v50 }
  0xd7   :  { %v91_v53 = vrot.slane %v90_v51, 2  ;;  %v78_v54 = vrot.slane %v77_v52, 2 }
  0xd9   :  { %v92_v55 = vadd.f32 %v91_v53, %v90_v51  ;;  %v79_v56 = vadd.f32 %v78_v54, %v77_v52 }
  0xdb   :  { %v80_v57 = vrot.slane %v79_v56, 1  ;;  %v93_v58 = vrot.slane %v92_v55, 1 }
  0xdd   :  { %v81_v59 = vadd.f32 %v80_v57, %v79_v56  ;;  %v94_v60 = vadd.f32 %v93_v58, %v92_v55 }
  0xdf   :  { %115 = vpush %v81_v59 }
  0xe0   :  { %117 = vpush %v94_v60 }
 0x106   :  { %s114_s0 = spop %113 }
 0x107   :  { %71 = sst [smem:[#allocation5]] %s114_s0 }
 0x110   :  { %s116_s15 = spop %115 }
 0x111   :  { %84 = sst [smem:[#allocation5 + $0x1]] %s116_s15  ;;  %s118_s16 = spop %117 }
 0x112   :  { %97 = sst [smem:[#allocation5 + $0x2]] %s118_s16 }
 0x113   :  { %138 = shalt.err (!%p135_p4)
}
 0x114   :  { %s142_s18 = smov [#allocation5]  }
 0x115   :  { %107 = dma.smem_to_vmem %s142_s18, 16, %s105_s14, [#allocation6]  }
 0x116   :  { %139 = dma.done.wait [#allocation6], 16  }
 0x117   :  { %140 = vsyncadd [#allocation6], 4294967280 }
 0x118   :  { %111 = sfence }
 0x119   :  { %112 = vsyncpa [#allocation6], 1 }

</bundles_post_ra>
